<compile_context>
chip_gen: v5e
topology: v5e:2x2
jax: 0.10.0
libtpu: 0.0.40
codegen_flags: <defaults>
</compile_context>

<pallas_src>
import functools

import jax
import jax.numpy as jnp
from jax.experimental import pallas as pl
from jax.experimental.pallas import tpu as pltpu


LEAKY_SLOPE = 0.01   # nn.LeakyReLU default negative_slope
SUBLANE = 8


def _round_up(x, m):
    return ((x + m - 1) // m) * m


# --------------------------------------------------------------------------
# One-time parameter preparation (hoisted out of the forward path).
# --------------------------------------------------------------------------
def prepare_params(params, compute_dtype=jnp.bfloat16):
    """Cast weights to the MXU compute dtype and reshape biases to (1, D).

    Do this ONCE (e.g. at model-load time); `mlp_forward` then performs no
    per-call pad/convert/reshape XLA work.
    """
    prepared = []
    for w, b in params:
        prepared.append((jnp.asarray(w, compute_dtype),
                         jnp.asarray(b, jnp.float32).reshape(1, -1)))
    return prepared


# --------------------------------------------------------------------------
# Fused kernel: whole MLP for one batch tile.
# --------------------------------------------------------------------------
def _mlp_fused_kernel(*refs, n_layers):
    """refs = (x_ref, w0_ref, b0_ref, ..., w_{L-1}_ref, b_{L-1}_ref, o_ref).

    Weights arrive pre-cast to the MXU compute dtype; biases are f32 (1, D).
    Intermediates live entirely in vregs/VMEM; only the final [tm, D_out]
    result is stored to HBM.
    """
    x_ref, o_ref = refs[0], refs[-1]
    params = refs[1:-1]
    compute_dtype = params[0].dtype

    # In-kernel cast of the input tile (x is DMA'd in its original dtype).
    h = x_ref[...].astype(compute_dtype)
    for i in range(n_layers):
        w = params[2 * i][...]                           # compute_dtype
        b = params[2 * i + 1][...]                       # f32, (1, D_out_i)
        acc = jnp.dot(h, w, preferred_element_type=jnp.float32) + b
        if i < n_layers - 1:
            # LeakyReLU epilogue in f32 (v5e has no bf16 VPU).
            acc = jnp.where(acc >= 0.0, acc, LEAKY_SLOPE * acc)
            h = acc.astype(compute_dtype)                # back to MXU dtype
        else:
            o_ref[...] = acc.astype(o_ref.dtype)


# --------------------------------------------------------------------------
# Wrapper
# --------------------------------------------------------------------------
def mlp_forward(x, prepared_params, last_op=None, *, tm=None, interpret=False):
    """Runs the whole MLP as one fused Pallas kernel.

    x: [..., D_in] (leading dims are flattened into the batch axis, so many
       head invocations sharing weights can be stacked into one call).
    prepared_params: output of `prepare_params` (list of (w [D_in,D_out],
       b [1,D_out])).
    """
    orig_shape = x.shape
    D_in = orig_shape[-1]
    x2 = x.reshape(-1, D_in)
    B = x2.shape[0]
    n_layers = len(prepared_params)
    D_out = prepared_params[-1][0].shape[1]

    # ---- batch tiling ----------------------------------------------------
    # Large tiles (cap 2048 rows) -> few serial grid steps on single-TC
    # v5e/v6e; for B >= 256 force an even grid >= 2 so both v7x TensorCores
    # get work.  Pad only to n_tiles * tm (never nearly doubles work).
    CAP = 2048
    if tm is not None:
        tm = _round_up(max(int(tm), SUBLANE), SUBLANE)   # enforce sublane mult.
        n_tiles = pl.cdiv(B, tm)
    else:
        n_tiles = pl.cdiv(B, CAP)
        if B >= 256:
            n_tiles = max(n_tiles, 2)
            n_tiles += n_tiles % 2                       # even for 2-TC v7x
        tm = _round_up(pl.cdiv(B, n_tiles), SUBLANE)
    B_pad = n_tiles * tm
    if B_pad != B:
        x2 = jnp.pad(x2, ((0, B_pad - B), (0, 0)))       # ragged batch -> zeros

    # VMEM budget: weights+biases ~tens of KB, double-buffered x/out tiles at
    # tm<=2048 are ~a few MiB total — far under the scoped default on all of
    # v5e/v6e/v7x, so no vmem_limit_bytes override is needed.
    inputs = [x2]
    in_specs = [pl.BlockSpec((tm, D_in), lambda i: (i, 0))]
    for (w, b) in prepared_params:
        inputs += [w, b]
        in_specs += [
            pl.BlockSpec(w.shape, lambda i: (0, 0)),     # VMEM-resident weights
            pl.BlockSpec(b.shape, lambda i: (0, 0)),
        ]

    kernel = functools.partial(_mlp_fused_kernel, n_layers=n_layers)
    out = pl.pallas_call(
        kernel,
        out_shape=jax.ShapeDtypeStruct((B_pad, D_out), x.dtype),
        grid_spec=pltpu.PrefetchScalarGridSpec(
            num_scalar_prefetch=0,
            grid=(n_tiles,),
            in_specs=in_specs,
            # Direct D_out store (masked vst) — cheaper than a 128-lane padded
            # slab that would be re-read and re-sliced in the wrapper.
            out_specs=pl.BlockSpec((tm, D_out), lambda i: (i, 0)),
        ),
        compiler_params=pltpu.CompilerParams(
            dimension_semantics=("parallel",)),          # shard tiles (v7x 2 TCs)
        interpret=interpret,
    )(*inputs)

    y = out[:B].reshape(orig_shape[:-1] + (D_out,))
    if last_op is not None:
        y = last_op(y)
    # TODO(synk): for many per-frame heads with *different* weights, add a
    # leading head grid axis with per-head weight BlockSpecs so one pallas_call
    # covers all heads (shared-weight heads are already covered by stacking
    # them into the leading batch dims above).
    return y


# --------------------------------------------------------------------------
# Reference + init helpers
# --------------------------------------------------------------------------
def init_mlp_params(key, dims, dtype=jnp.float32):
    """Deterministic init mimicking nn.Linear's uniform(-1/sqrt(fan_in), ...)."""
    params = []
    for i in range(len(dims) - 1):
        key, kw, kb = jax.random.split(key, 3)
        fan_in, fan_out = dims[i], dims[i + 1]
        bound = 1.0 / jnp.sqrt(fan_in)
        w = jax.random.uniform(kw, (fan_in, fan_out), dtype, -bound, bound)
        b = jax.random.uniform(kb, (fan_out,), dtype, -bound, bound)
        params.append((w, b))
    return params


def mlp_reference(x, params, last_op=None):
    n = len(params)
    y = x
    for i, (w, b) in enumerate(params):
        y = y @ w + b
        if i < n - 1:
            y = jnp.where(y >= 0.0, y, LEAKY_SLOPE * y)
    if last_op is not None:
        y = last_op(y)
    return y


if __name__ == "__main__":
    dims = [32, 64, 64, 16]   # MLP(dims=[32, 64, 64, 16], last_op=None)
    batch = 16

    key = jax.random.PRNGKey(0)
    key, kx = jax.random.split(key)
    x = jax.random.normal(kx, (batch, dims[0]), jnp.float32)
    params = init_mlp_params(key, dims)
    ref = mlp_reference(x, params, last_op=None)

    # Default path: bf16 MXU operands, f32 accumulation + f32 epilogue.
    p_bf16 = prepare_params(params, compute_dtype=jnp.bfloat16)
    out = jax.block_until_ready(mlp_forward(x, p_bf16, last_op=None))
    assert out.shape == (batch, dims[-1])
    assert jnp.allclose(out, ref, atol=5e-2, rtol=5e-2), "bf16 mismatch vs reference"

    # f32-operand path (exact check).
    p_f32 = prepare_params(params, compute_dtype=jnp.float32)
    out_f32 = jax.block_until_ready(mlp_forward(x, p_f32, last_op=None))
    assert jnp.allclose(out_f32, ref, atol=1e-4, rtol=1e-4), "f32 mismatch vs reference"

    # Ragged batch (not a multiple of the sublane tile) — handled by padding.
    x_odd = x[:11]
    out_odd = jax.block_until_ready(mlp_forward(x_odd, p_f32, last_op=None))
    assert jnp.allclose(out_odd, mlp_reference(x_odd, params),
                        atol=1e-4, rtol=1e-4), "ragged-batch mismatch"

    # Stacked leading dims (many shared-weight head calls fused into one launch).
    key, kx2 = jax.random.split(key)
    x_heads = jax.random.normal(kx2, (3, 5, dims[0]), jnp.float32)
    out_heads = jax.block_until_ready(mlp_forward(x_heads, p_f32, last_op=None))
    assert out_heads.shape == (3, 5, dims[-1])
    assert jnp.allclose(out_heads, mlp_reference(x_heads, params),
                        atol=1e-4, rtol=1e-4), "stacked-heads mismatch"

    # Larger batch exercising the multi-tile (even-grid) path.
    key, kx3 = jax.random.split(key)
    x_big = jax.random.normal(kx3, (300, dims[0]), jnp.float32)
    out_big = jax.block_until_ready(mlp_forward(x_big, p_bf16, last_op=None))
    assert out_big.shape == (300, dims[-1])
    assert jnp.allclose(out_big, mlp_reference(x_big, params),
                        atol=5e-2, rtol=5e-2), "multi-tile mismatch"

    print("KERNEL_OK")
</pallas_src>

<mosaic_0001>
module attributes {stable_mosaic.version = 11 : i64} {
  func.func @_mlp_fused_kernel(%arg0: i32, %arg1: memref<16x32xf32, #tpu.memory_space<vmem>>, %arg2: memref<32x64xbf16, #tpu.memory_space<vmem>>, %arg3: memref<1x64xf32, #tpu.memory_space<vmem>>, %arg4: memref<64x64xbf16, #tpu.memory_space<vmem>>, %arg5: memref<1x64xf32, #tpu.memory_space<vmem>>, %arg6: memref<64x16xbf16, #tpu.memory_space<vmem>>, %arg7: memref<1x16xf32, #tpu.memory_space<vmem>>, %arg8: memref<16x16xf32, #tpu.memory_space<vmem>>) attributes {dimension_semantics = [#tpu.dimension_semantics<parallel>], iteration_bounds = array<i64: 1>, scalar_prefetch = 0 : i64, scratch_operands = 0 : i64, tpu.core_type = #tpu.core_type<tc>, window_params = [{transform_indices = @transform_0, window_bounds = array<i64: 16, 32>}, {pipeline_mode = #tpu.pipeline_mode<synchronous>, transform_indices = @transform_1, window_bounds = array<i64: 32, 64>}, {pipeline_mode = #tpu.pipeline_mode<synchronous>, transform_indices = @transform_2, window_bounds = array<i64: 1, 64>}, {pipeline_mode = #tpu.pipeline_mode<synchronous>, transform_indices = @transform_3, window_bounds = array<i64: 64, 64>}, {pipeline_mode = #tpu.pipeline_mode<synchronous>, transform_indices = @transform_4, window_bounds = array<i64: 1, 64>}, {pipeline_mode = #tpu.pipeline_mode<synchronous>, transform_indices = @transform_5, window_bounds = array<i64: 64, 16>}, {pipeline_mode = #tpu.pipeline_mode<synchronous>, transform_indices = @transform_6, window_bounds = array<i64: 1, 16>}, {transform_indices = @transform_7, window_bounds = array<i64: 16, 16>}]} {
    %c0 = arith.constant 0 : index
    %c0_0 = arith.constant 0 : index
    %0 = vector.load %arg1[%c0, %c0_0] : memref<16x32xf32, #tpu.memory_space<vmem>>, vector<16x32xf32>
    %1 = arith.truncf %0 : vector<16x32xf32> to vector<16x32xbf16>
    %c0_1 = arith.constant 0 : index
    %c0_2 = arith.constant 0 : index
    %2 = vector.load %arg2[%c0_1, %c0_2] : memref<32x64xbf16, #tpu.memory_space<vmem>>, vector<32x64xbf16>
    %c0_3 = arith.constant 0 : index
    %c0_4 = arith.constant 0 : index
    %3 = vector.load %arg3[%c0_3, %c0_4] : memref<1x64xf32, #tpu.memory_space<vmem>>, vector<1x64xf32>
    %cst = arith.constant dense<0.000000e+00> : vector<16x64xf32>
    %4 = tpu.matmul %1, %2, %cst {dimension_numbers = #tpu.dot_dimension_numbers<[1], [0], [0], [1], [0, 0, 1, 1], [], []>} : vector<16x32xbf16>, vector<32x64xbf16>, vector<16x64xf32> -> vector<16x64xf32>
    %5 = vector.broadcast %3 : vector<1x64xf32> to vector<16x64xf32>
    %6 = arith.addf %4, %5 : vector<16x64xf32>
    %cst_5 = arith.constant 0.000000e+00 : f32
    %7 = vector.broadcast %cst_5 : f32 to vector<16x64xf32>
    %8 = arith.cmpf oge, %6, %7 : vector<16x64xf32>
    %cst_6 = arith.constant 0.00999999977 : f32
    %9 = vector.broadcast %cst_6 : f32 to vector<16x64xf32>
    %10 = arith.mulf %9, %6 : vector<16x64xf32>
    %11 = arith.select %8, %6, %10 : vector<16x64xi1>, vector<16x64xf32>
    %12 = arith.truncf %11 : vector<16x64xf32> to vector<16x64xbf16>
    %c0_7 = arith.constant 0 : index
    %c0_8 = arith.constant 0 : index
    %13 = vector.load %arg4[%c0_7, %c0_8] : memref<64x64xbf16, #tpu.memory_space<vmem>>, vector<64x64xbf16>
    %c0_9 = arith.constant 0 : index
    %c0_10 = arith.constant 0 : index
    %14 = vector.load %arg5[%c0_9, %c0_10] : memref<1x64xf32, #tpu.memory_space<vmem>>, vector<1x64xf32>
    %cst_11 = arith.constant dense<0.000000e+00> : vector<16x64xf32>
    %15 = tpu.matmul %12, %13, %cst_11 {dimension_numbers = #tpu.dot_dimension_numbers<[1], [0], [0], [1], [0, 0, 1, 1], [], []>} : vector<16x64xbf16>, vector<64x64xbf16>, vector<16x64xf32> -> vector<16x64xf32>
    %16 = vector.broadcast %14 : vector<1x64xf32> to vector<16x64xf32>
    %17 = arith.addf %15, %16 : vector<16x64xf32>
    %cst_12 = arith.constant 0.000000e+00 : f32
    %18 = vector.broadcast %cst_12 : f32 to vector<16x64xf32>
    %19 = arith.cmpf oge, %17, %18 : vector<16x64xf32>
    %cst_13 = arith.constant 0.00999999977 : f32
    %20 = vector.broadcast %cst_13 : f32 to vector<16x64xf32>
    %21 = arith.mulf %20, %17 : vector<16x64xf32>
    %22 = arith.select %19, %17, %21 : vector<16x64xi1>, vector<16x64xf32>
    %23 = arith.truncf %22 : vector<16x64xf32> to vector<16x64xbf16>
    %c0_14 = arith.constant 0 : index
    %c0_15 = arith.constant 0 : index
    %24 = vector.load %arg6[%c0_14, %c0_15] : memref<64x16xbf16, #tpu.memory_space<vmem>>, vector<64x16xbf16>
    %c0_16 = arith.constant 0 : index
    %c0_17 = arith.constant 0 : index
    %25 = vector.load %arg7[%c0_16, %c0_17] : memref<1x16xf32, #tpu.memory_space<vmem>>, vector<1x16xf32>
    %cst_18 = arith.constant dense<0.000000e+00> : vector<16x16xf32>
    %26 = tpu.matmul %23, %24, %cst_18 {dimension_numbers = #tpu.dot_dimension_numbers<[1], [0], [0], [1], [0, 0, 1, 1], [], []>} : vector<16x64xbf16>, vector<64x16xbf16>, vector<16x16xf32> -> vector<16x16xf32>
    %27 = vector.broadcast %25 : vector<1x16xf32> to vector<16x16xf32>
    %28 = arith.addf %26, %27 : vector<16x16xf32>
    %c0_19 = arith.constant 0 : index
    %c0_20 = arith.constant 0 : index
    %29 = vector.load %arg8[%c0_19, %c0_20] : memref<16x16xf32, #tpu.memory_space<vmem>>, vector<16x16xf32>
    tpu.vector_store %arg8[%c0_19, %c0_20], %28 {strides = array<i32>} : memref<16x16xf32, #tpu.memory_space<vmem>>, vector<16x16xf32>,
    return
  }
  func.func @transform_0(%arg0: i32) -> (i32, i32) {
    %c0_i32 = arith.constant 0 : i32
    %c0_i32_0 = arith.constant 0 : i32
    return %arg0, %c0_i32 : i32, i32
  }
  func.func @transform_1(%arg0: i32) -> (i32, i32) {
    %c0_i32 = arith.constant 0 : i32
    %c0_i32_0 = arith.constant 0 : i32
    %c0_i32_1 = arith.constant 0 : i32
    return %c0_i32, %c0_i32_0 : i32, i32
  }
  func.func @transform_2(%arg0: i32) -> (i32, i32) {
    %c0_i32 = arith.constant 0 : i32
    %c0_i32_0 = arith.constant 0 : i32
    %c0_i32_1 = arith.constant 0 : i32
    return %c0_i32, %c0_i32_0 : i32, i32
  }
  func.func @transform_3(%arg0: i32) -> (i32, i32) {
    %c0_i32 = arith.constant 0 : i32
    %c0_i32_0 = arith.constant 0 : i32
    %c0_i32_1 = arith.constant 0 : i32
    return %c0_i32, %c0_i32_0 : i32, i32
  }
  func.func @transform_4(%arg0: i32) -> (i32, i32) {
    %c0_i32 = arith.constant 0 : i32
    %c0_i32_0 = arith.constant 0 : i32
    %c0_i32_1 = arith.constant 0 : i32
    return %c0_i32, %c0_i32_0 : i32, i32
  }
  func.func @transform_5(%arg0: i32) -> (i32, i32) {
    %c0_i32 = arith.constant 0 : i32
    %c0_i32_0 = arith.constant 0 : i32
    %c0_i32_1 = arith.constant 0 : i32
    return %c0_i32, %c0_i32_0 : i32, i32
  }
  func.func @transform_6(%arg0: i32) -> (i32, i32) {
    %c0_i32 = arith.constant 0 : i32
    %c0_i32_0 = arith.constant 0 : i32
    %c0_i32_1 = arith.constant 0 : i32
    return %c0_i32, %c0_i32_0 : i32, i32
  }
  func.func @transform_7(%arg0: i32) -> (i32, i32) {
    %c0_i32 = arith.constant 0 : i32
    %c0_i32_0 = arith.constant 0 : i32
    return %arg0, %c0_i32 : i32, i32
  }
}

</mosaic_0001>

<bundles_post_ra>
// kernel: tpu_custom_call.1
= control target key start
LH: loop header
LB: loop body
LE: loop exit
PB: predicated region body
PF: predicated region fallthrough
CT: control target
= control target key end

     0   :  { %12 = vsyncpa [#allocation3], 0  ;;  %s483_s0 = inlined_call_operand.hbm [shape: f32[16,32], index: 0, kind: input, shape index: {}]   ;;  %s484_s1 = inlined_call_operand.hbm [shape: bf16[32,64], index: 1, kind: input, shape index: {}]   ;;  %s485_s2 = inlined_call_operand.vmem [shape: f32[1,64], index: 2, kind: input, shape index: {}]   ;;  %s486_s3 = inlined_call_operand.vmem [shape: bf16[64,64], index: 3, kind: input, shape index: {}]   ;;  %s487_s4 = inlined_call_operand.vmem [shape: f32[1,64], index: 4, kind: input, shape index: {}]   ;;  %s488_s5 = inlined_call_operand.vmem [shape: bf16[64,16], index: 5, kind: input, shape index: {}]   ;;  %s489_s6 = inlined_call_operand.vmem [shape: f32[1,16], index: 6, kind: input, shape index: {}]   ;;  %s490_s7 = inlined_call_operand.hbm [shape: f32[16,16], index: 7, kind: output, shape index: {}]  }
   0x1   :  { %13 = vsyncpa [#allocation6], 0 }
   0x2   :  { %14 = vsyncpa [#allocation4], 0  ;;  %s19_s26 = sshll.u32 %s483_s0, 4  ;;  %s386_s27 = smov [#allocation2]   ;;  %s20_s26 = int_to_ptr.hbm [resolvable:$true] %s19_s26 }
   0x3   :  { %s21_s28 = sshll.u32 %s386_s27, 4  ;;  %s32_s8 = sshll.u32 %s484_s1, 4  ;;  %s22_s28 = int_to_ptr.vmem [resolvable:$true] %s21_s28  ;;  %s33_s8 = int_to_ptr.hbm [resolvable:$true] %s32_s8 }
   0x4   :  { %s387_s9 = smov 128   ;;  %s388_s10 = smov 8  }
   0x5   :  { %27 = dma.hbm_to_vmem [thread:$0]  %s20_s26, 256, %s22_s28, [#allocation3], %s387_s9, %s387_s9, %s388_s10  }
   0x6   :  { %s389_s11 = smov [#allocation5]   ;;  %s390_s13 = smov 64  }
   0x7   :  { %s34_s12 = sshll.u32 %s389_s11, 4  ;;  %s391_s0 = smov 4   ;;  %s35_s12 = int_to_ptr.vmem [resolvable:$true] %s34_s12 }
   0x8   :  { %40 = dma.hbm_to_vmem [thread:$0]  %s33_s8, 256, %s35_s12, [#allocation6], %s390_s13, %s390_s13, %s391_s0  }
   0x9   :  { %380 = dma.done.wait [#allocation3], 256  }
   0xa   :  { %381 = vsyncadd [#allocation3], 4294967040 }
   0xb   :  { %382 = dma.done.wait [#allocation6], 256  }
   0xc   :  { %383 = vsyncadd [#allocation6], 4294967040  ;;  %v289_v0 = vld [vmem:[#allocation5 + $0x8] sm:$0xff]  ;;  %v288_v1 = vld [vmem:[#allocation5] sm:$0xff]  ;;  %vm83_vm0 = vcmask 261120   ;;  %vm144_vm3 = vcmask 523264  }
   0xd   :  { %v60_v2 = vld [vmem:[#allocation2] sm:$0xff]  ;;  %93 = vmatpush.bf16.msra.mxu0 %v289_v0  ;;  %v61_v3 = vld [vmem:[#allocation2 + $0x8] sm:$0xff]  ;;  %v293_v5 = vld [vmem:[%s486_s3 + $0x18] sm:$0xff]  ;;  %vm222_vm6 = vcmask 130048   ;;  %s231_s0 = sshll.u32 %s490_s7, 4  ;;  %s232_s0 = int_to_ptr.hbm [resolvable:$true] %s231_s0 }
   0xe   :  { %v62_v4 = vpack.c.bf16 %v61_v3, %v60_v2  ;;  %152 = vmatpush.bf16.msra.mxu1 %v293_v5  ;;  %v292_v6 = vld [vmem:[%s486_s3 + $0x10] sm:$0xff]  ;;  %v291_v7 = vld [vmem:[%s486_s3 + $0x8] sm:$0xff]  ;;  %v290_v8 = vld [vmem:[%s486_s3] sm:$0xff] }
   0xf   :  { %v305_v10 = vld [vmem:[%s485_s2] ss:$0 sm:$0xff]  ;;  %v297_v19 = vld [vmem:[%s488_s5 + $0x18] sm:$0xff]  ;;  %v296_v20 = vld [vmem:[%s488_s5 + $0x10] sm:$0xff] }
  0x10   :  { %212 = vmatpush.bf16.msra.mxu2 %v297_v19  ;;  %v295_v21 = vld [vmem:[%s488_s5 + $0x8] sm:$0xff]  ;;  %v294_v22 = vld [vmem:[%s488_s5] sm:$0xff] }
  0x11   :  { %94 = vmatpush.bf16.msra.mxu0 %v288_v1  ;;  %v306_v24 = vld [vmem:[%s487_s4] ss:$0 sm:$0xff]  ;;  %s392_s4 = smov [#allocation7]  }
  0x12   :  { %153 = vmatpush.bf16.msra.mxu1 %v292_v6  ;;  %v307_v33 = vld [vmem:[%s489_s6] ss:$0 sm:$0xff]  ;;  %s229_s11 = sshll.u32 %s392_s4, 4  ;;  %s230_s11 = int_to_ptr.vmem [resolvable:$true] %s229_s11 }
  0x14   :  { %253 = vmatmul.msk.bf16.vlgmr.msra.gmra.mxu0 %vm83_vm0, %v62_v4  ;;  %213 = vmatpush.bf16.msra.mxu2 %v296_v20 }
  0x16   :  { %154 = vmatpush.bf16.msra.mxu1 %v291_v7 }
  0x18   :  { %214 = vmatpush.bf16.msra.mxu2 %v295_v21 }
  0x1a   :  { %155 = vmatpush.bf16.msra.mxu1 %v290_v8 }
  0x1c   :  { %215 = vmatpush.bf16.msra.mxu2 %v294_v22 }
  0x91   :  { %v96_v9 = vpop.f32.mrf.mxu0 }
  0x92   :  { %v97_v11 = vadd.f32 %v305_v10, %v96_v9 }
  0x94   :  { %v103_v13 = vmul.f32 0.01, %v97_v11  ;;  %vm101_vm1 = vcmp.ge.f32.partialorder %v97_v11, 0.0 }
  0x96   :  { %v105_v16 = vsel %vm101_vm1, %v97_v11, %v103_v13 }
  0x99   :  { %v98_v12 = vpop.f32.mrf.mxu0 }
  0x9a   :  { %v99_v14 = vadd.f32 %v305_v10, %v98_v12 }
  0x9c   :  { %vm102_vm2 = vcmp.ge.f32.partialorder %v99_v14, 0.0  ;;  %v104_v15 = vmul.f32 0.01, %v99_v14 }
  0x9e   :  { %v106_v17 = vsel %vm102_vm2, %v99_v14, %v104_v15 }
  0x9f   :  { %v107_v18 = vpack.c.bf16 %v106_v17, %v105_v16 }
  0xa1   :  { %270 = vmatmul.msk.bf16.vlgmr.msra.gmra.mxu1 %vm144_vm3, %v107_v18 }
 0x11e   :  { %v157_v23 = vpop.f32.mrf.mxu1 }
 0x11f   :  { %v158_v25 = vadd.f32 %v306_v24, %v157_v23 }
 0x121   :  { %v164_v27 = vmul.f32 0.01, %v158_v25  ;;  %vm162_vm4 = vcmp.ge.f32.partialorder %v158_v25, 0.0 }
 0x123   :  { %v166_v30 = vsel %vm162_vm4, %v158_v25, %v164_v27 }
 0x126   :  { %v159_v26 = vpop.f32.mrf.mxu1 }
 0x127   :  { %v160_v28 = vadd.f32 %v306_v24, %v159_v26 }
 0x129   :  { %vm163_vm5 = vcmp.ge.f32.partialorder %v160_v28, 0.0  ;;  %v165_v29 = vmul.f32 0.01, %v160_v28 }
 0x12b   :  { %v167_v31 = vsel %vm163_vm5, %v160_v28, %v165_v29 }
 0x12c   :  { %v168_v32 = vpack.c.bf16 %v167_v31, %v166_v30 }
 0x12e   :  { %287 = vmatmul.msk.bf16.vlgmr.msra.gmra.mxu2 %vm144_vm3, %v168_v32 }
 0x1b1   :  { %v217_v34 = vpop.f32.mrf.mxu2 }
 0x1b2   :  { %v218_v35 = vadd.f32 %v307_v33, %v217_v34 }
 0x1b4   :  { %223 = vst.msk [vmem:[#allocation7] sm:$0xff] %vm222_vm6, %v218_v35 }
 0x1b9   :  { %v219_v36 = vpop.f32.mrf.mxu2 }
 0x1ba   :  { %v220_v37 = vadd.f32 %v307_v33, %v219_v36 }
 0x1bc   :  { %224 = vst.msk [vmem:[#allocation7 + $0x8] sm:$0xff] %vm222_vm6, %v220_v37 }
 0x1bd   :  { %237 = dma.vmem_to_hbm [thread:$0]  %s230_s11, 256, %s232_s0, [#allocation4], %s387_s9, %s387_s9, %s388_s10  }
 0x1be   :  { %384 = dma.done.wait [#allocation4], 256  }
 0x1bf   :  { %385 = vsyncadd [#allocation4], 4294967040 }
 0x1c0   :  { %242 = vsyncpa [#allocation3], 1 }
 0x1c1   :  { %243 = vsyncpa [#allocation6], 1 }
 0x1c2   :  { %244 = vsyncpa [#allocation4], 1 }

</bundles_post_ra>
